<compile_context>
chip_gen: v6e
topology: v6e:2x2x1
jax: 0.10.0
libtpu: 0.0.40
codegen_flags: <defaults>
</compile_context>

<pallas_src>
import functools

import jax
import jax.numpy as jnp
from jax import lax
from jax.experimental import pallas as pl
from jax.experimental.pallas import tpu as pltpu

BN_EPS = 1e-5
_MAX_TILE_HW = 4096            # beyond this, per-step overhead is fully amortized
_FALLBACK_VMEM = 64 * 1024 * 1024   # v7x per-TC physical VMEM (most restrictive)


def _round_up(x, m):
    return (x + m - 1) // m * m


def _vmem_limit_bytes():
    """Per-generation scoped-VMEM budget: ~75% of physical, capped at 112 MiB.

    v5e/v6e (128 MiB) -> 96 MiB; v7x (64 MiB) -> 48 MiB; unknown -> 48 MiB.
    """
    cap = _FALLBACK_VMEM
    try:
        cap = int(pltpu.get_tpu_info().vmem_capacity_bytes)
    except Exception:
        pass
    return min((cap * 3) // 4, 112 * 1024 * 1024)


def _pick_tile_hw(k, cout_p, hw, vmem_bytes):
    """Largest lane-dense hw tile that fits the VMEM budget (double-buffered)."""
    # pass 1 per-column bytes: patches bf16 (dbuf) + y bf16 (dbuf)
    per_col_p1 = 2 * (k * 2) + 2 * (cout_p * 2)
    # pass 2 per-column bytes: y bf16 (dbuf) + out f32 (dbuf)
    per_col_p2 = 2 * (cout_p * 2) + 2 * (cout_p * 4)
    per_col = max(per_col_p1, per_col_p2)
    fixed = 2 * cout_p * k * 2 + (4 << 20)        # resident weights (dbuf) + slack
    budget = max(vmem_bytes - fixed, 128 * per_col)
    tile = budget // per_col
    tile = min(tile, _MAX_TILE_HW, _round_up(hw, 128))
    return max(128, (tile // 128) * 128)


# ---------------------------------------------------------------------------
# Pass 1: conv GEMM (flipped, lane-dense output) + per-tile channel sum/sumsq.
# ---------------------------------------------------------------------------
def _conv_stats_kernel(w_ref, p_ref, y_ref, sum_ref, ssq_ref):
    # w_ref:   (Cout_p, K)       bf16  weights, resident (constant index_map)
    # p_ref:   (K, tile_hw)      bf16  im2col patches tile (hw on lanes)
    # y_ref:   (Cout_p, tile_hw) bf16  conv output tile (lane-dense store)
    # sum_ref: (Cout_p, 1)       f32   per-tile partial (no cross-tile state)
    # ssq_ref: (Cout_p, 1)       f32   per-tile partial
    y = jnp.dot(w_ref[...], p_ref[...], preferred_element_type=jnp.float32)
    y_ref[...] = y.astype(y_ref.dtype)
    # Per-channel reductions over hw are lane reductions (XLU) in this layout.
    sum_ref[...] = jnp.sum(y, axis=1, keepdims=True)
    ssq_ref[...] = jnp.sum(y * y, axis=1, keepdims=True)


# ---------------------------------------------------------------------------
# Pass 2: normalize + affine + ReLU (pure elementwise, independent tiles).
# ---------------------------------------------------------------------------
def _bn_relu_kernel(y_ref, scale_ref, shift_ref, o_ref):
    y = y_ref[...].astype(jnp.float32)
    o_ref[...] = jnp.maximum(y * scale_ref[...] + shift_ref[...], 0.0)


def _im2col(x, kh, kw, stride, padding, dilation):
    """x: (N, Cin, H, W) -> patches (N, Cin*kh*kw, Ho*Wo) bf16, plus Ho, Wo.

    bf16 cast happens BEFORE the kh*kw expansion, and the stack keeps Ho*Wo as
    the minor axis so no major-axis transpose of the 9x-expanded tensor is
    needed (K index order = (cin, kh, kw), matching weight.reshape(Cout, K)).
    """
    n, cin, h, w = x.shape
    h_out = (h + 2 * padding - dilation * (kh - 1) - 1) // stride + 1
    w_out = (w + 2 * padding - dilation * (kw - 1) - 1) // stride + 1
    xb = x.astype(jnp.bfloat16)
    xp = jnp.pad(xb, ((0, 0), (0, 0), (padding, padding), (padding, padding)))
    cols = []
    for i in range(kh):
        for j in range(kw):
            hi, wj = i * dilation, j * dilation
            sl = xp[:, :, hi:hi + stride * (h_out - 1) + 1:stride,
                          wj:wj + stride * (w_out - 1) + 1:stride]
            cols.append(sl.reshape(n, cin, h_out * w_out))
    p = jnp.stack(cols, axis=2)                       # (N, Cin, kh*kw, Ho*Wo)
    p = p.reshape(n, cin * kh * kw, h_out * w_out)    # (N, K, Ho*Wo)
    return p, h_out, w_out


@functools.partial(jax.jit,
                   static_argnames=("stride", "padding", "dilation", "tile_hw"))
def conv_bn_relu(x, weight, gamma, beta, *, stride=1, padding=0, dilation=1,
                 tile_hw=None):
    """x: (N, Cin, H, W) f32; weight: (Cout, Cin, kh, kw) f32 (PyTorch layout)."""
    n, cin, h, w = x.shape
    cout, _, kh, kw = weight.shape
    k = cin * kh * kw

    patches, h_out, w_out = _im2col(x, kh, kw, stride, padding, dilation)
    hw = h_out * w_out
    cout_p = _round_up(cout, 8)                # sublane alignment
    vmem_limit = _vmem_limit_bytes()

    # ---- tile / padding -----------------------------------------------------
    if tile_hw is None:
        tile_hw = _pick_tile_hw(k, cout_p, hw, vmem_limit)
    tile_hw = max(128, _round_up(min(int(tile_hw), _round_up(hw, 128)), 128))
    hw_pad = _round_up(hw, tile_hw)
    t_hw = hw_pad // tile_hw

    # Zero padding of hw is statistics-neutral (adds 0 to sum/sumsq; we divide
    # by the true element count) and is sliced off at the end.
    patches = jnp.pad(patches, ((0, 0), (0, 0), (0, hw_pad - hw)))
    w_mat = jnp.pad(weight.reshape(cout, k), ((0, cout_p - cout), (0, 0)))
    w_mat = w_mat.astype(jnp.bfloat16)
    gamma_p = jnp.pad(gamma.astype(jnp.float32),
                      (0, cout_p - cout)).reshape(cout_p, 1)
    beta_p = jnp.pad(beta.astype(jnp.float32),
                     (0, cout_p - cout)).reshape(cout_p, 1)

    grid = (n, t_hw)

    # ---- pass 1: conv GEMM + per-tile channel sum / sum-of-squares ----------
    y_bf16, psum, pssq = pl.pallas_call(
        _conv_stats_kernel,
        out_shape=(
            jax.ShapeDtypeStruct((n, cout_p, hw_pad), jnp.bfloat16),
            jax.ShapeDtypeStruct((n, t_hw, cout_p, 1), jnp.float32),
            jax.ShapeDtypeStruct((n, t_hw, cout_p, 1), jnp.float32),
        ),
        grid_spec=pl.GridSpec(
            grid=grid,
            in_specs=[
                pl.BlockSpec((cout_p, k), lambda b, i: (0, 0)),          # weights
                pl.BlockSpec((None, k, tile_hw), lambda b, i: (b, 0, i)),  # patches
            ],
            out_specs=(
                pl.BlockSpec((None, cout_p, tile_hw), lambda b, i: (b, 0, i)),
                pl.BlockSpec((None, None, cout_p, 1), lambda b, i: (b, i, 0, 0)),
                pl.BlockSpec((None, None, cout_p, 1), lambda b, i: (b, i, 0, 0)),
            ),
        ),
        compiler_params=pltpu.CompilerParams(
            dimension_semantics=("parallel", "parallel"),   # no cross-tile state
            vmem_limit_bytes=vmem_limit),
    )(w_mat, patches)

    # ---- BN statistics -> per-channel scale / shift (tiny, O(Cout*T)) -------
    ch_sum = jnp.sum(psum, axis=(0, 1))          # (Cout_p, 1)
    ch_ssq = jnp.sum(pssq, axis=(0, 1))          # (Cout_p, 1)
    inv_m = 1.0 / float(n * hw)                  # true count (padding is neutral)
    mean = ch_sum * inv_m
    var = jnp.maximum(ch_ssq * inv_m - mean * mean, 0.0)   # biased variance
    inv_std = lax.rsqrt(var + BN_EPS)
    scale = gamma_p * inv_std
    shift = beta_p - mean * scale

    # ---- pass 2: normalize + affine + ReLU, written directly in NCHW order --
    out_pad = pl.pallas_call(
        _bn_relu_kernel,
        out_shape=jax.ShapeDtypeStruct((n, cout_p, hw_pad), jnp.float32),
        grid_spec=pl.GridSpec(
            grid=grid,
            in_specs=[
                pl.BlockSpec((None, cout_p, tile_hw), lambda b, i: (b, 0, i)),
                pl.BlockSpec((cout_p, 1), lambda b, i: (0, 0)),
                pl.BlockSpec((cout_p, 1), lambda b, i: (0, 0)),
            ],
            out_specs=pl.BlockSpec((None, cout_p, tile_hw),
                                   lambda b, i: (b, 0, i)),
        ),
        compiler_params=pltpu.CompilerParams(
            dimension_semantics=("parallel", "parallel"),
            vmem_limit_bytes=vmem_limit),
    )(y_bf16, scale, shift)

    # Output is already N-major / channel / spatial: only slice off padding.
    return out_pad[:, :cout, :hw].reshape(n, cout, h_out, w_out)


def _reference(x, weight, gamma, beta, *, stride, padding, dilation):
    y = lax.conv_general_dilated(
        x, weight,
        window_strides=(stride, stride),
        padding=[(padding, padding), (padding, padding)],
        rhs_dilation=(dilation, dilation),
        dimension_numbers=("NCHW", "OIHW", "NCHW"))
    mean = jnp.mean(y, axis=(0, 2, 3), keepdims=True)
    var = jnp.mean((y - mean) ** 2, axis=(0, 2, 3), keepdims=True)
    y_hat = (y - mean) * lax.rsqrt(var + BN_EPS)
    y_hat = y_hat * gamma.reshape(1, -1, 1, 1) + beta.reshape(1, -1, 1, 1)
    return jnp.maximum(y_hat, 0.0)


if __name__ == "__main__":
    key = jax.random.PRNGKey(0)
    k_x, k_w = jax.random.split(key)

    # Module config: conv_bn_relu(in_channels=4, out_channels=8, kernel_size=3,
    #                             stride=1, padding=1, bias=False)
    N, Cin, H, W = 2, 4, 16, 16
    Cout, KH, KW = 8, 3, 3
    stride, padding, dilation = 1, 1, 1

    x = jax.random.normal(k_x, (N, Cin, H, W), dtype=jnp.float32)
    weight = jax.random.normal(k_w, (Cout, Cin, KH, KW), dtype=jnp.float32) * 0.1
    # BatchNorm affine params (non-trivial so the affine path is exercised).
    gamma = 1.0 + 0.1 * jnp.arange(Cout, dtype=jnp.float32)
    beta = 0.05 * jnp.arange(Cout, dtype=jnp.float32)

    ref = _reference(x, weight, gamma, beta,
                     stride=stride, padding=padding, dilation=dilation)

    # 1) default path: VMEM-derived tile (single hw tile per image here).
    out = conv_bn_relu(x, weight, gamma, beta,
                       stride=stride, padding=padding, dilation=dilation)
    out = jax.block_until_ready(out)
    assert out.shape == (N, Cout, H, W)
    # bf16 MXU operands + bf16 y intermediate (f32 accumulation / BN math)
    # -> relaxed tolerance vs the all-f32 XLA reference.
    assert jnp.allclose(out, ref, atol=5e-2, rtol=5e-2), (
        float(jnp.max(jnp.abs(out - ref))))

    # 2) forced small tile (128) so the toy problem (Ho*Wo = 256) runs a
    #    (2, 2) grid and exercises the per-tile statistics partials reduction.
    out_t = conv_bn_relu(x, weight, gamma, beta,
                         stride=stride, padding=padding, dilation=dilation,
                         tile_hw=128)
    out_t = jax.block_until_ready(out_t)
    assert jnp.allclose(out_t, ref, atol=5e-2, rtol=5e-2), (
        float(jnp.max(jnp.abs(out_t - ref))))

    print("KERNEL_OK")
</pallas_src>

<mosaic_0001>
module attributes {stable_mosaic.version = 11 : i64} {
  func.func @_bn_relu_kernel(%arg0: i32, %arg1: i32, %arg2: memref<1x8x256xbf16, #tpu.memory_space<vmem>>, %arg3: memref<8x1xf32, #tpu.memory_space<vmem>>, %arg4: memref<8x1xf32, #tpu.memory_space<vmem>>, %arg5: memref<1x8x256xf32, #tpu.memory_space<vmem>>) attributes {dimension_semantics = [#tpu.dimension_semantics<parallel>, #tpu.dimension_semantics<parallel>], iteration_bounds = array<i64: 2, 1>, scalar_prefetch = 0 : i64, scratch_operands = 0 : i64, tpu.core_type = #tpu.core_type<tc>, window_params = [{transform_indices = @transform_0, window_bounds = array<i64: 1, 8, 256>}, {pipeline_mode = #tpu.pipeline_mode<synchronous>, transform_indices = @transform_1, window_bounds = array<i64: 8, 1>}, {pipeline_mode = #tpu.pipeline_mode<synchronous>, transform_indices = @transform_2, window_bounds = array<i64: 8, 1>}, {transform_indices = @transform_3, window_bounds = array<i64: 1, 8, 256>}]} {
    %c0 = arith.constant 0 : index
    %c0_0 = arith.constant 0 : index
    %c0_1 = arith.constant 0 : index
    %0 = vector.load %arg2[%c0, %c0_0, %c0_1] : memref<1x8x256xbf16, #tpu.memory_space<vmem>>, vector<1x8x256xbf16>
    %1 = vector.shape_cast %0 : vector<1x8x256xbf16> to vector<8x256xbf16>
    %2 = arith.extf %1 : vector<8x256xbf16> to vector<8x256xf32>
    %c0_2 = arith.constant 0 : index
    %c0_3 = arith.constant 0 : index
    %3 = vector.load %arg3[%c0_2, %c0_3] : memref<8x1xf32, #tpu.memory_space<vmem>>, vector<8x1xf32>
    %4 = vector.broadcast %3 : vector<8x1xf32> to vector<8x256xf32>
    %5 = arith.mulf %2, %4 : vector<8x256xf32>
    %c0_4 = arith.constant 0 : index
    %c0_5 = arith.constant 0 : index
    %6 = vector.load %arg4[%c0_4, %c0_5] : memref<8x1xf32, #tpu.memory_space<vmem>>, vector<8x1xf32>
    %7 = vector.broadcast %6 : vector<8x1xf32> to vector<8x256xf32>
    %8 = arith.addf %5, %7 : vector<8x256xf32>
    %cst = arith.constant 0.000000e+00 : f32
    %9 = vector.broadcast %cst : f32 to vector<8x256xf32>
    %10 = arith.maximumf %8, %9 : vector<8x256xf32>
    %c0_6 = arith.constant 0 : index
    %c0_7 = arith.constant 0 : index
    %c0_8 = arith.constant 0 : index
    %11 = vector.load %arg5[%c0_6, %c0_7, %c0_8] : memref<1x8x256xf32, #tpu.memory_space<vmem>>, vector<1x8x256xf32>
    %12 = vector.shape_cast %11 : vector<1x8x256xf32> to vector<8x256xf32>
    %13 = vector.shape_cast %10 : vector<8x256xf32> to vector<1x8x256xf32>
    tpu.vector_store %arg5[%c0_6, %c0_7, %c0_8], %13 {strides = array<i32>} : memref<1x8x256xf32, #tpu.memory_space<vmem>>, vector<1x8x256xf32>,
    return
  }
  func.func @transform_0(%arg0: i32, %arg1: i32) -> (i32, i32, i32) {
    %c0_i32 = arith.constant 0 : i32
    %c0_i32_0 = arith.constant 0 : i32
    return %arg0, %c0_i32, %arg1 : i32, i32, i32
  }
  func.func @transform_1(%arg0: i32, %arg1: i32) -> (i32, i32) {
    %c0_i32 = arith.constant 0 : i32
    %c0_i32_0 = arith.constant 0 : i32
    %c0_i32_1 = arith.constant 0 : i32
    return %c0_i32, %c0_i32_0 : i32, i32
  }
  func.func @transform_2(%arg0: i32, %arg1: i32) -> (i32, i32) {
    %c0_i32 = arith.constant 0 : i32
    %c0_i32_0 = arith.constant 0 : i32
    %c0_i32_1 = arith.constant 0 : i32
    return %c0_i32, %c0_i32_0 : i32, i32
  }
  func.func @transform_3(%arg0: i32, %arg1: i32) -> (i32, i32, i32) {
    %c0_i32 = arith.constant 0 : i32
    %c0_i32_0 = arith.constant 0 : i32
    return %arg0, %c0_i32, %arg1 : i32, i32, i32
  }
}

module attributes {stable_mosaic.version = 11 : i64} {
  func.func @_conv_stats_kernel(%arg0: i32, %arg1: i32, %arg2: memref<8x36xbf16, #tpu.memory_space<vmem>>, %arg3: memref<1x36x256xbf16, #tpu.memory_space<vmem>>, %arg4: memref<1x8x256xbf16, #tpu.memory_space<vmem>>, %arg5: memref<1x1x8x1xf32, #tpu.memory_space<vmem>>, %arg6: memref<1x1x8x1xf32, #tpu.memory_space<vmem>>) attributes {dimension_semantics = [#tpu.dimension_semantics<parallel>, #tpu.dimension_semantics<parallel>], iteration_bounds = array<i64: 2, 1>, scalar_prefetch = 0 : i64, scratch_operands = 0 : i64, tpu.core_type = #tpu.core_type<tc>, window_params = [{pipeline_mode = #tpu.pipeline_mode<synchronous>, transform_indices = @transform_0, window_bounds = array<i64: 8, 36>}, {transform_indices = @transform_1, window_bounds = array<i64: 1, 36, 256>}, {transform_indices = @transform_2, window_bounds = array<i64: 1, 8, 256>}, {transform_indices = @transform_3, window_bounds = array<i64: 1, 1, 8, 1>}, {transform_indices = @transform_4, window_bounds = array<i64: 1, 1, 8, 1>}]} {
    %c0 = arith.constant 0 : index
    %c0_0 = arith.constant 0 : index
    %0 = vector.load %arg2[%c0, %c0_0] : memref<8x36xbf16, #tpu.memory_space<vmem>>, vector<8x36xbf16>
    %c0_1 = arith.constant 0 : index
    %c0_2 = arith.constant 0 : index
    %c0_3 = arith.constant 0 : index
    %1 = vector.load %arg3[%c0_1, %c0_2, %c0_3] : memref<1x36x256xbf16, #tpu.memory_space<vmem>>, vector<1x36x256xbf16>
    %2 = vector.shape_cast %1 : vector<1x36x256xbf16> to vector<36x256xbf16>
    %cst = arith.constant dense<0.000000e+00> : vector<8x256xf32>
    %3 = tpu.matmul %0, %2, %cst {dimension_numbers = #tpu.dot_dimension_numbers<[1], [0], [0], [1], [0, 0, 1, 1], [], []>} : vector<8x36xbf16>, vector<36x256xbf16>, vector<8x256xf32> -> vector<8x256xf32>
    %4 = arith.truncf %3 : vector<8x256xf32> to vector<8x256xbf16>
    %c0_4 = arith.constant 0 : index
    %c0_5 = arith.constant 0 : index
    %c0_6 = arith.constant 0 : index
    %5 = vector.load %arg4[%c0_4, %c0_5, %c0_6] : memref<1x8x256xbf16, #tpu.memory_space<vmem>>, vector<1x8x256xbf16>
    %6 = vector.shape_cast %5 : vector<1x8x256xbf16> to vector<8x256xbf16>
    %7 = vector.shape_cast %4 : vector<8x256xbf16> to vector<1x8x256xbf16>
    tpu.vector_store %arg4[%c0_4, %c0_5, %c0_6], %7 {strides = array<i32>} : memref<1x8x256xbf16, #tpu.memory_space<vmem>>, vector<1x8x256xbf16>,
    %cst_7 = arith.constant dense<0.000000e+00> : vector<8xf32>
    %8 = vector.multi_reduction <add>, %3, %cst_7 [1] : vector<8x256xf32> to vector<8xf32>
    %9 = vector.shape_cast %8 : vector<8xf32> to vector<8x1xf32>
    %c0_8 = arith.constant 0 : index
    %c0_9 = arith.constant 0 : index
    %c0_10 = arith.constant 0 : index
    %c0_11 = arith.constant 0 : index
    %10 = vector.load %arg5[%c0_8, %c0_9, %c0_10, %c0_11] : memref<1x1x8x1xf32, #tpu.memory_space<vmem>>, vector<1x1x8x1xf32>
    %11 = vector.shape_cast %10 : vector<1x1x8x1xf32> to vector<8x1xf32>
    %12 = vector.shape_cast %9 : vector<8x1xf32> to vector<1x1x8x1xf32>
    tpu.vector_store %arg5[%c0_8, %c0_9, %c0_10, %c0_11], %12 {strides = array<i32>} : memref<1x1x8x1xf32, #tpu.memory_space<vmem>>, vector<1x1x8x1xf32>,
    %13 = arith.mulf %3, %3 : vector<8x256xf32>
    %cst_12 = arith.constant dense<0.000000e+00> : vector<8xf32>
    %14 = vector.multi_reduction <add>, %13, %cst_12 [1] : vector<8x256xf32> to vector<8xf32>
    %15 = vector.shape_cast %14 : vector<8xf32> to vector<8x1xf32>
    %c0_13 = arith.constant 0 : index
    %c0_14 = arith.constant 0 : index
    %c0_15 = arith.constant 0 : index
    %c0_16 = arith.constant 0 : index
    %16 = vector.load %arg6[%c0_13, %c0_14, %c0_15, %c0_16] : memref<1x1x8x1xf32, #tpu.memory_space<vmem>>, vector<1x1x8x1xf32>
    %17 = vector.shape_cast %16 : vector<1x1x8x1xf32> to vector<8x1xf32>
    %18 = vector.shape_cast %15 : vector<8x1xf32> to vector<1x1x8x1xf32>
    tpu.vector_store %arg6[%c0_13, %c0_14, %c0_15, %c0_16], %18 {strides = array<i32>} : memref<1x1x8x1xf32, #tpu.memory_space<vmem>>, vector<1x1x8x1xf32>,
    return
  }
  func.func @transform_0(%arg0: i32, %arg1: i32) -> (i32, i32) {
    %c0_i32 = arith.constant 0 : i32
    %c0_i32_0 = arith.constant 0 : i32
    %c0_i32_1 = arith.constant 0 : i32
    return %c0_i32, %c0_i32_0 : i32, i32
  }
  func.func @transform_1(%arg0: i32, %arg1: i32) -> (i32, i32, i32) {
    %c0_i32 = arith.constant 0 : i32
    %c0_i32_0 = arith.constant 0 : i32
    return %arg0, %c0_i32, %arg1 : i32, i32, i32
  }
  func.func @transform_2(%arg0: i32, %arg1: i32) -> (i32, i32, i32) {
    %c0_i32 = arith.constant 0 : i32
    %c0_i32_0 = arith.constant 0 : i32
    return %arg0, %c0_i32, %arg1 : i32, i32, i32
  }
  func.func @transform_3(%arg0: i32, %arg1: i32) -> (i32, i32, i32, i32) {
    %c0_i32 = arith.constant 0 : i32
    %c0_i32_0 = arith.constant 0 : i32
    %c0_i32_1 = arith.constant 0 : i32
    return %arg0, %arg1, %c0_i32, %c0_i32_0 : i32, i32, i32, i32
  }
  func.func @transform_4(%arg0: i32, %arg1: i32) -> (i32, i32, i32, i32) {
    %c0_i32 = arith.constant 0 : i32
    %c0_i32_0 = arith.constant 0 : i32
    %c0_i32_1 = arith.constant 0 : i32
    return %arg0, %arg1, %c0_i32, %c0_i32_0 : i32, i32, i32, i32
  }
}

</mosaic_0001>

<bundles_post_ra>
// kernel: conv_bn_relu.3
= control target key start
LH: loop header
LB: loop body
LE: loop exit
PB: predicated region body
PF: predicated region fallthrough
CT: control target
= control target key end

     0   :  { %s404_s12 = smov 0   ;;  %s406_s13 = smov 0   ;;  %s443_s0 = inlined_call_operand.vmem [shape: bf16[2,8,256], index: 0, kind: input, shape index: {}]   ;;  %s444_s1 = inlined_call_operand.vmem [shape: f32[8,1], index: 1, kind: input, shape index: {}]   ;;  %s445_s2 = inlined_call_operand.vmem [shape: f32[8,1], index: 2, kind: input, shape index: {}]   ;;  %s446_s3 = inlined_call_operand.vmem [shape: f32[2,8,256], index: 3, kind: output, shape index: {}]  }
   0x1   :  { %s408_s14 = smov 0  }
   0x2 LB: > { %s25_s15 = sadd.s32 1, %s377_s13  ;;  %p324_p0 = scmp.ge.s32.totalorder %s381_s14, 1  ;;  %s381_s14 = sphi %s408_s14, %s13_s14   ;;  %s377_s13 = sphi %s406_s13, %s448_s13   ;;  %s373_s12 = sphi %s404_s12, %s447_s12  }
   0x3   : > { %p27_p1 = scmp.ge.s32.totalorder %s25_s15, 2  ;;  %p158_p2 = scmp.lt.s32.totalorder %s381_s14, 3 }
   0x5   : > { %s450_s15 = smov (%p27_p1, %s25_s15), 0  ;;  %p159_p3 = pnand %p324_p0, %p158_p2 }
   0x6   : > { %p191_p4 = scmp.lt.s32.totalorder (!%p159_p3), %s373_s12, 1 }
   0x7   : > { %162 = sbr.rel (%p159_p3) target bundleno = 147 (0x93), region = 32 }
   0xc   : > { %v213_v0 = vld [vmem:[%s444_s1] sm:$0xff]  ;;  %v383_v1 = vmov 0   ;;  %s452_s12 = smov (!%p191_p4, %s373_s12), 1 }
   0xd   : > { %358 = vset.pattern.permute.xlu0 %v383_v1  ;;  %v221_v2 = vld [vmem:[%s445_s2] sm:$0xff]  ;;  %s331_s20 = sshll.u32 %s452_s12, 3  ;;  %s332_s24 = sshll.u32 %s452_s12, 4 }
   0xe   : > { %216 = vperm.xlu0 %358, %v213_v0   ;;  %s198_s23 = scalar_lea.vmem %s443_s0, %s331_s20  ;;  %s208_s27 = scalar_lea.vmem %s446_s3, %s332_s24 }
   0xf   : > { %v210_v3 = vld [vmem:[%s198_s23] sm:$0xff] }
  0x10   : > { %v211_v4 = vunpack.c.l.bf16 %v210_v3  ;;  %v212_v5 = vunpack.c.h.bf16 %v210_v3 }
  0x12   : > { %224 = vperm.xlu0 %358, %v221_v2  }
  0x89   : > { %v217_v6 = vpop.permute.xlu0 %216 }
  0x8a   : > { %v219_v7 = vmul.f32 %v217_v6, %v211_v4  ;;  %v220_v8 = vmul.f32 %v217_v6, %v212_v5 }
  0x8d   : > { %v225_v9 = vpop.permute.xlu0 %224 }
  0x8e   : > { %v227_v10 = vadd.f32 %v225_v9, %v219_v7  ;;  %v228_v11 = vadd.f32 %v225_v9, %v220_v8 }
  0x90   : > { %v229_v12 = vmax.f32 %v227_v10, 0.0  ;;  %v230_v13 = vmax.f32 %v228_v11, 0.0 }
  0x92   : > { %231 = vst [vmem:[%s208_s27] sm:$0xff] %v229_v12  ;;  %232 = vst [vmem:[%s208_s27 + $0x8] sm:$0xff] %v230_v13 }
  0x93 PF: > { %s13_s14 = sadd.s32 1, %s381_s14   ;;  %s447_s12 = smov %s377_s13 }
  0x94   : > { %p10_p5 = scmp.ge.s32.totalorder %s13_s14, 4   ;;  %s448_s13 = smov %s450_s15 }
  0x96   :  { %12 = sbr.rel (!%p10_p5) target bundleno = 2 (0x2), region = 62 }

// kernel: conv_bn_relu.2
= control target key start
LH: loop header
LB: loop body
LE: loop exit
PB: predicated region body
PF: predicated region fallthrough
CT: control target
= control target key end

     0   :  { %s654_s15 = smov 0   ;;  %s656_s16 = smov 0   ;;  %s696_s0 = inlined_call_operand.vmem [shape: bf16[8,36], index: 0, kind: input, shape index: {}]   ;;  %s697_s1 = inlined_call_operand.vmem [shape: bf16[2,36,256], index: 1, kind: input, shape index: {}]   ;;  %s698_s2 = inlined_call_operand.vmem [shape: bf16[2,8,256], index: 2, kind: output, shape index: {0}]   ;;  %s699_s3 = inlined_call_operand.vmem [shape: f32[2,1,8,1], index: 3, kind: output, shape index: {1}]   ;;  %s700_s4 = inlined_call_operand.vmem [shape: f32[2,1,8,1], index: 4, kind: output, shape index: {2}]  }
   0x1   :  { %s658_s17 = smov 0  }
   0x2 LB: > { %s27_s18 = sadd.s32 1, %s622_s16  ;;  %p551_p0 = scmp.ge.s32.totalorder %s626_s17, 1  ;;  %s626_s17 = sphi %s658_s17, %s15_s17   ;;  %s622_s16 = sphi %s656_s16, %s702_s16   ;;  %s618_s15 = sphi %s654_s15, %s701_s15  }
   0x3   : > { %p29_p1 = scmp.ge.s32.totalorder %s27_s18, 2  ;;  %p192_p2 = scmp.lt.s32.totalorder %s626_s17, 3 }
   0x5   : > { %s704_s18 = smov (%p29_p1, %s27_s18), 0  ;;  %p193_p3 = pnand %p551_p0, %p192_p2 }
   0x6   : > { %p241_p4 = scmp.lt.s32.totalorder (!%p193_p3), %s618_s15, 1 }
   0x7   : > { %196 = sbr.rel (%p193_p3) target bundleno = 371 (0x173), region = 28 }
   0xc   : > { %v628_v0 = vmov 0   ;;  %s706_s15 = smov (!%p241_p4, %s618_s15), 1  ;;  %vm310_vm0 = vcmask 1041408   ;;  %v275_v9 = vld [vmem:[%s696_s0] sm:$0xf]  ;;  %vm306_vm1 = vcmask 293888  }
   0xd   : > { %349 = vmatprep.mubr.bf16.mxu0 %v628_v0  ;;  %s570_s19 = smul.u32 40, %s706_s15  ;;  %s568_s25 = sshll.u32 %s706_s15, 3  ;;  %vm370_vm2 = vcmask 7168  }
   0xe   : > { %s258_s28 = scalar_lea.vmem %s698_s2, %s568_s25  ;;  %s266_s5 = scalar_lea.vmem %s699_s3, %s568_s25 }
   0xf   : > { %s248_s22 = scalar_lea.vmem %s697_s1, %s570_s19  ;;  %s273_s8 = scalar_lea.vmem %s700_s4, %s568_s25 }
  0x10   : > { %v280_v1 = vld [vmem:[%s248_s22 + $0x20] sm:$0x33]  ;;  %v598_v4 = vld [vmem:[%s248_s22 + $0x14] ss:$8 sps:$4 sm:$0xff]   ;;  %v600_v6 = vld [vmem:[%s248_s22 + $0x10] ss:$8 sps:$4 sm:$0xff]  }
  0x11   : > { %v562_v2 = vcombine.high %v280_v1, %v280_v1  ;;  %v561_v3 = vcombine.low %v280_v1, %v280_v1  ;;  %v601_v7 = vld [vmem:[%s248_s22 + $0x4] ss:$8 sps:$4 sm:$0xff]   ;;  %v603_v8 = vld [vmem:[%s248_s22] ss:$8 sps:$4 sm:$0xff]  }
  0x13   : > { %563 = vmatprep.subr.msk.bf16.mxu0 %vm310_vm0, %v562_v2  ;;  %v312_v5 = vsel %vm310_vm0, %v561_v3, 0 }
  0x14   : > { %328 = vmatpush1.bf16.msra.mxu0 %v312_v5 }
  0x15   : > { %329 = vmatprep.subr.bf16.mxu0 %v598_v4 }
  0x18   : > { %330 = vmatpush1.bf16.msra.mxu0 %v600_v6 }
  0x19   : > { %331 = vmatprep.subr.bf16.mxu0 %v601_v7 }
  0x1c   : > { %332 = vmatpush1.bf16.msra.mxu0 %v603_v8 }
  0x1f   : > { %564 = vmatmul.mubr.msk.bf16.vlgmr.msra.gmra.mxu0 %vm306_vm1, %v275_v9 }
  0xdf   : > { %v351_v10 = vpop.f32.mrf.mxu0 }
  0xe0   : > { %v372_v16 = vmul.f32 %v351_v10, %v351_v10 }
  0xe1   : > { %v353_v11 = vpop.f32.mrf.mxu0 }
  0xe2   : > { %v569_v12 = vpack.c.bf16 %v353_v11, %v351_v10  ;;  %v367_v13 = vadd.f32 %v353_v11, %v351_v10  ;;  %v373_v14 = vmul.f32 %v353_v11, %v353_v11 }
  0xe3   : > { %v355_v15 = vpop.f32.mrf.mxu0 }
  0xe4   : > { %366 = vst [vmem:[%s258_s28] sm:$0xff] %v569_v12  ;;  %368 = vadd.xlane.f32.xlu0 %v367_v13  ;;  %v374_v18 = vadd.f32 %v373_v14, %v372_v16 }
  0xe5   : > { %v356_v17 = vpop.f32.mrf.mxu0 }
  0xe8   : > { %375 = vadd.xlane.f32.xlu0 %v374_v18 }
 0x16d   : > { %v369_v19 = vpop.xlane.xlu0 %368 }
 0x16e   : > { %371 = vst.msk [vmem:[%s266_s5] sm:$0xff] %vm370_vm2, %v369_v19 }
 0x171   : > { %v376_v20 = vpop.xlane.xlu0 %375 }
 0x172   : > { %377 = vst.msk [vmem:[%s273_s8] sm:$0xff] %vm370_vm2, %v376_v20 }
 0x173 PF: > { %s15_s17 = sadd.s32 1, %s626_s17   ;;  %s701_s15 = smov %s622_s16 }
 0x174   : > { %p12_p5 = scmp.ge.s32.totalorder %s15_s17, 4   ;;  %s702_s16 = smov %s704_s18 }
 0x176   :  { %14 = sbr.rel (!%p12_p5) target bundleno = 2 (0x2), region = 82 }

</bundles_post_ra>
